<compile_context>
chip_gen: v5e
topology: v5e:2x2
jax: 0.10.0
libtpu: 0.0.40
codegen_flags: <defaults>
</compile_context>

<pallas_src>
import functools

import jax
import jax.numpy as jnp
from jax import lax
from jax.experimental import pallas as pl
from jax.experimental.pallas import tpu as pltpu


def _cdiv(a, b):
    return -(-a // b)


def _round_up(a, b):
    return _cdiv(a, b) * b


def _masked_loss_kernel(thr_ref, rec_ref, tgt_ref, l1_ref, l2_ref,
                        acc1_ref, acc2_ref, *, rows):
    """One (rows, 128) slab of one pseudo-batch row.

    thr_ref            : SMEM (n_rows_total,) int32 scalar-prefetch thresholds
                         (already shifted by the pseudo-row's flat offset).
    rec_ref, tgt_ref   : VMEM (rows, 128) input blocks (any float dtype).
    l1_ref, l2_ref     : VMEM (1, 128) f32 outputs — per-lane partial sums,
                         written once at the last chunk step (lane-dense store).
    acc1_ref, acc2_ref : VMEM (rows, 128) f32 scratch accumulators.
    """
    b = pl.program_id(0)
    c = pl.program_id(1)

    @pl.when(c == 0)
    def _():
        acc1_ref[...] = jnp.zeros_like(acc1_ref)
        acc2_ref[...] = jnp.zeros_like(acc2_ref)

    diff = rec_ref[...].astype(jnp.float32) - tgt_ref[...].astype(jnp.float32)

    # Block-local flat index (grid-invariant iota); the chunk offset is folded
    # into the scalar threshold side:  flat < thr - c*rows*128.
    flat = (lax.broadcasted_iota(jnp.int32, (rows, 128), 0) * 128
            + lax.broadcasted_iota(jnp.int32, (rows, 128), 1))
    local_thr = thr_ref[b] - c * (rows * 128)
    d = jnp.where(flat < local_thr, diff, 0.0)       # mask applied once

    acc1_ref[...] += jnp.abs(d)                       # pure elementwise adds
    acc2_ref[...] += d * d

    @pl.when(c == pl.num_programs(1) - 1)
    def _():
        l1_ref[...] = jnp.sum(acc1_ref[...], axis=0, keepdims=True)
        l2_ref[...] = jnp.sum(acc2_ref[...], axis=0, keepdims=True)


def compute_masked_l1_l2(reconstructed, targets, lengths,
                         *, target_block_bytes=2 << 20):
    """Returns (l1_loss, l2_loss) matching BaseDecoder._compute_l{1,2}_loss
    with `lengths` provided (lengths == T for all b reproduces the unmasked
    F.l1_loss / F.mse_loss path)."""
    B, T, D = targets.shape
    F = T * D
    assert F < 2**31, "flat feature index must fit in int32"
    itemsize = jnp.dtype(targets.dtype).itemsize

    # Split a lone batch row into 2 pseudo-rows so the 'parallel' grid axis
    # always has >= 2 blocks (keeps both v7x TensorCores busy).
    n_split = 2 if B == 1 else 1
    n_prows = B * n_split                                   # pseudo-batch rows

    # Rows per block: ~target_block_bytes per input block, multiple of 16
    # sublanes (covers f32 and packed bf16), capped at 4096 to bound scratch.
    # n_chunks is chosen first so padding overshoot stays < one chunk.
    rows_needed = _round_up(_cdiv(_cdiv(F, n_split), 128), 16)
    r_target = max(16, min(4096, (target_block_bytes // (128 * itemsize))
                           // 16 * 16))
    n_chunks = _cdiv(rows_needed, r_target)
    R = _round_up(_cdiv(rows_needed, n_chunks), 16)
    Fs_pad = n_chunks * R * 128                             # per pseudo-row
    F_total = n_split * Fs_pad

    # Lane/sublane-dense view: [B, T, D] -> [B*n_split, Fs_pad/128, 128].
    rec2 = jnp.reshape(reconstructed, (B, F))
    tgt2 = jnp.reshape(targets, (B, F))
    if F_total != F:
        rec2 = jnp.pad(rec2, ((0, 0), (0, F_total - F)))
        tgt2 = jnp.pad(tgt2, ((0, 0), (0, F_total - F)))
        # padded elements have flat index >= F >= lengths*D → masked out.
    rec3 = rec2.reshape(n_prows, Fs_pad // 128, 128)
    tgt3 = tgt2.reshape(n_prows, Fs_pad // 128, 128)

    # Per pseudo-row threshold: element with block-local flat index f inside
    # pseudo-row s of batch b is valid iff  s*Fs_pad + f < lengths[b]*D.
    base_thr = lengths.astype(jnp.int32) * jnp.int32(D)          # (B,)
    split_off = jnp.arange(n_split, dtype=jnp.int32) * jnp.int32(Fs_pad)
    thr = (base_thr[:, None] - split_off[None, :]).reshape(n_prows)

    # VMEM budget: 2 inputs x double-buffer x block + 2 f32 scratch blocks.
    vmem_need = 2 * 2 * R * 128 * itemsize + 2 * R * 128 * 4
    vmem_limit = int(max(vmem_need + (4 << 20), 16 << 20))

    kernel = functools.partial(_masked_loss_kernel, rows=R)
    sums_l1, sums_l2 = pl.pallas_call(
        kernel,
        out_shape=(jax.ShapeDtypeStruct((n_prows, 1, 128), jnp.float32),
                   jax.ShapeDtypeStruct((n_prows, 1, 128), jnp.float32)),
        grid_spec=pltpu.PrefetchScalarGridSpec(
            num_scalar_prefetch=1,
            grid=(n_prows, n_chunks),
            in_specs=[
                pl.BlockSpec((None, R, 128), lambda b, c, thr_ref: (b, c, 0)),
                pl.BlockSpec((None, R, 128), lambda b, c, thr_ref: (b, c, 0)),
            ],
            out_specs=[
                pl.BlockSpec((None, 1, 128), lambda b, c, thr_ref: (b, 0, 0)),
                pl.BlockSpec((None, 1, 128), lambda b, c, thr_ref: (b, 0, 0)),
            ],
            scratch_shapes=[pltpu.VMEM((R, 128), jnp.float32),
                            pltpu.VMEM((R, 128), jnp.float32)],
        ),
        compiler_params=pltpu.CompilerParams(
            dimension_semantics=("parallel", "arbitrary"),
            vmem_limit_bytes=vmem_limit),
        cost_estimate=pl.CostEstimate(
            flops=7 * n_prows * Fs_pad,
            transcendentals=0,
            bytes_accessed=2 * n_prows * Fs_pad * itemsize
                           + 2 * n_prows * 128 * 4),
    )(thr, rec3, tgt3)

    # Tiny JAX glue: 128-lane + split reduce, hoisted /D, /length, batch mean.
    # NOTE: lengths[b] == 0 yields NaN, identical to the PyTorch reference.
    per_b_l1 = sums_l1.reshape(B, -1).sum(axis=1)
    per_b_l2 = sums_l2.reshape(B, -1).sum(axis=1)
    denom = lengths.astype(jnp.float32) * jnp.float32(D)
    return jnp.mean(per_b_l1 / denom), jnp.mean(per_b_l2 / denom)


def _reference_losses(rec, tgt, lengths):
    """Pure-JAX reference mirroring the PyTorch static methods (f32 math)."""
    rec = rec.astype(jnp.float32)
    tgt = tgt.astype(jnp.float32)
    T = tgt.shape[1]
    mask = (jnp.arange(T)[None, :] < lengths[:, None]).astype(jnp.float32)
    len_f = lengths.astype(jnp.float32)
    per_l1 = jnp.sum(jnp.mean(jnp.abs(rec - tgt), axis=-1) * mask, axis=-1) / len_f
    per_l2 = jnp.sum(jnp.mean(jnp.square(rec - tgt), axis=-1) * mask, axis=-1) / len_f
    return jnp.mean(per_l1), jnp.mean(per_l2)


if __name__ == "__main__":
    key = jax.random.PRNGKey(0)
    k1, k2 = jax.random.split(key)

    # --- f32 case (B=2, max_audio_time=16, out_dim=32) ----------------------
    B, T, D = 2, 16, 32
    reconstructed = jax.random.normal(k1, (B, T, D), dtype=jnp.float32)
    targets = jax.random.normal(k2, (B, T, D), dtype=jnp.float32)
    lengths = jnp.array([16, 9], dtype=jnp.int32)

    l1, l2 = compute_masked_l1_l2(reconstructed, targets, lengths)
    jax.block_until_ready((l1, l2))
    ref_l1, ref_l2 = _reference_losses(reconstructed, targets, lengths)
    assert jnp.allclose(l1, ref_l1, rtol=1e-5, atol=1e-5)
    assert jnp.allclose(l2, ref_l2, rtol=1e-5, atol=1e-5)

    # --- bf16 inputs (halves HBM traffic; kernel upcasts to f32) ------------
    rec_bf = reconstructed.astype(jnp.bfloat16)
    tgt_bf = targets.astype(jnp.bfloat16)
    l1b, l2b = compute_masked_l1_l2(rec_bf, tgt_bf, lengths)
    jax.block_until_ready((l1b, l2b))
    ref_l1b, ref_l2b = _reference_losses(rec_bf, tgt_bf, lengths)
    assert jnp.allclose(l1b, ref_l1b, rtol=1e-4, atol=1e-4)
    assert jnp.allclose(l2b, ref_l2b, rtol=1e-4, atol=1e-4)

    # --- shape exercising the flat-dim padding path (T*D not % 128) ---------
    B2, T2, D2 = 3, 10, 24
    k3, k4 = jax.random.split(k1)
    rec_c = jax.random.normal(k3, (B2, T2, D2), dtype=jnp.float32)
    tgt_c = jax.random.normal(k4, (B2, T2, D2), dtype=jnp.float32)
    lengths_c = jnp.array([10, 7, 4], dtype=jnp.int32)
    l1c, l2c = compute_masked_l1_l2(rec_c, tgt_c, lengths_c)
    jax.block_until_ready((l1c, l2c))
    ref_l1c, ref_l2c = _reference_losses(rec_c, tgt_c, lengths_c)
    assert jnp.allclose(l1c, ref_l1c, rtol=1e-5, atol=1e-5)
    assert jnp.allclose(l2c, ref_l2c, rtol=1e-5, atol=1e-5)

    # --- B == 1 exercises the flat-axis split (2 parallel pseudo-rows) ------
    B3, T3, D3 = 1, 24, 32
    k5, k6 = jax.random.split(k2)
    rec_d = jax.random.normal(k5, (B3, T3, D3), dtype=jnp.float32)
    tgt_d = jax.random.normal(k6, (B3, T3, D3), dtype=jnp.float32)
    lengths_d = jnp.array([17], dtype=jnp.int32)
    l1d, l2d = compute_masked_l1_l2(rec_d, tgt_d, lengths_d)
    jax.block_until_ready((l1d, l2d))
    ref_l1d, ref_l2d = _reference_losses(rec_d, tgt_d, lengths_d)
    assert jnp.allclose(l1d, ref_l1d, rtol=1e-5, atol=1e-5)
    assert jnp.allclose(l2d, ref_l2d, rtol=1e-5, atol=1e-5)

    print("KERNEL_OK")
</pallas_src>

<mosaic_0001>
module attributes {stable_mosaic.version = 11 : i64} {
  func.func @_masked_loss_kernel(%arg0: i32, %arg1: i32, %arg2: memref<2xi32, #tpu.memory_space<smem>>, %arg3: memref<1x16x128xf32, #tpu.memory_space<vmem>>, %arg4: memref<1x16x128xf32, #tpu.memory_space<vmem>>, %arg5: memref<1x1x128xf32, #tpu.memory_space<vmem>>, %arg6: memref<1x1x128xf32, #tpu.memory_space<vmem>>, %arg7: memref<16x128xf32, #tpu.memory_space<vmem>>, %arg8: memref<16x128xf32, #tpu.memory_space<vmem>>) attributes {dimension_semantics = [#tpu.dimension_semantics<parallel>, #tpu.dimension_semantics<arbitrary>], iteration_bounds = array<i64: 2, 1>, scalar_prefetch = 1 : i64, scratch_operands = 2 : i64, tpu.core_type = #tpu.core_type<tc>, window_params = [{transform_indices = @transform_0, window_bounds = array<i64: 1, 16, 128>}, {transform_indices = @transform_1, window_bounds = array<i64: 1, 16, 128>}, {transform_indices = @transform_2, window_bounds = array<i64: 1, 1, 128>}, {transform_indices = @transform_3, window_bounds = array<i64: 1, 1, 128>}]} {
    %c0_i32 = arith.constant 0 : i32
    %0 = arith.cmpi eq, %arg1, %c0_i32 : i32
    %1 = arith.extui %0 : i1 to i32
    %c0_i32_0 = arith.constant 0 : i32
    %2 = arith.cmpi ne, %1, %c0_i32_0 : i32
    scf.if %2 {
      %cst_16 = arith.constant 0.000000e+00 : f32
      %32 = vector.broadcast %cst_16 : f32 to vector<16x128xf32>
      %c0_17 = arith.constant 0 : index
      %c0_18 = arith.constant 0 : index
      %33 = vector.load %arg7[%c0_17, %c0_18] : memref<16x128xf32, #tpu.memory_space<vmem>>, vector<16x128xf32>
      tpu.vector_store %arg7[%c0_17, %c0_18], %32 {strides = array<i32>} : memref<16x128xf32, #tpu.memory_space<vmem>>, vector<16x128xf32>,
      %cst_19 = arith.constant 0.000000e+00 : f32
      %34 = vector.broadcast %cst_19 : f32 to vector<16x128xf32>
      %c0_20 = arith.constant 0 : index
      %c0_21 = arith.constant 0 : index
      %35 = vector.load %arg8[%c0_20, %c0_21] : memref<16x128xf32, #tpu.memory_space<vmem>>, vector<16x128xf32>
      tpu.vector_store %arg8[%c0_20, %c0_21], %34 {strides = array<i32>} : memref<16x128xf32, #tpu.memory_space<vmem>>, vector<16x128xf32>,
    } else {
    }
    %c0 = arith.constant 0 : index
    %c0_1 = arith.constant 0 : index
    %c0_2 = arith.constant 0 : index
    %3 = vector.load %arg3[%c0, %c0_1, %c0_2] : memref<1x16x128xf32, #tpu.memory_space<vmem>>, vector<1x16x128xf32>
    %4 = vector.shape_cast %3 : vector<1x16x128xf32> to vector<16x128xf32>
    %c0_3 = arith.constant 0 : index
    %c0_4 = arith.constant 0 : index
    %c0_5 = arith.constant 0 : index
    %5 = vector.load %arg4[%c0_3, %c0_4, %c0_5] : memref<1x16x128xf32, #tpu.memory_space<vmem>>, vector<1x16x128xf32>
    %6 = vector.shape_cast %5 : vector<1x16x128xf32> to vector<16x128xf32>
    %7 = arith.subf %4, %6 : vector<16x128xf32>
    %8 = tpu.iota {dimensions = array<i32: 0>} : vector<16x128xi32>
    %c128_i32 = arith.constant 128 : i32
    %9 = vector.broadcast %c128_i32 : i32 to vector<16x128xi32>
    %10 = arith.muli %8, %9 : vector<16x128xi32>
    %11 = tpu.iota {dimensions = array<i32: 1>} : vector<16x128xi32>
    %12 = arith.addi %10, %11 : vector<16x128xi32>
    %13 = arith.index_cast %arg0 : i32 to index
    %14 = memref.load %arg2[%13] : memref<2xi32, #tpu.memory_space<smem>>
    %c2048_i32 = arith.constant 2048 : i32
    %15 = arith.muli %arg1, %c2048_i32 : i32
    %16 = arith.subi %14, %15 : i32
    %17 = vector.broadcast %16 : i32 to vector<16x128xi32>
    %18 = arith.cmpi slt, %12, %17 : vector<16x128xi32>
    %cst = arith.constant 0.000000e+00 : f32
    %19 = vector.broadcast %cst : f32 to vector<16x128xf32>
    %20 = arith.select %18, %7, %19 : vector<16x128xi1>, vector<16x128xf32>
    %c0_6 = arith.constant 0 : index
    %c0_7 = arith.constant 0 : index
    %21 = vector.load %arg7[%c0_6, %c0_7] : memref<16x128xf32, #tpu.memory_space<vmem>>, vector<16x128xf32>
    %22 = math.absf %20 : vector<16x128xf32>
    %23 = arith.addf %21, %22 : vector<16x128xf32>
    %c0_8 = arith.constant 0 : index
    %c0_9 = arith.constant 0 : index
    %24 = vector.load %arg7[%c0_8, %c0_9] : memref<16x128xf32, #tpu.memory_space<vmem>>, vector<16x128xf32>
    tpu.vector_store %arg7[%c0_8, %c0_9], %23 {strides = array<i32>} : memref<16x128xf32, #tpu.memory_space<vmem>>, vector<16x128xf32>,
    %c0_10 = arith.constant 0 : index
    %c0_11 = arith.constant 0 : index
    %25 = vector.load %arg8[%c0_10, %c0_11] : memref<16x128xf32, #tpu.memory_space<vmem>>, vector<16x128xf32>
    %26 = arith.mulf %20, %20 : vector<16x128xf32>
    %27 = arith.addf %25, %26 : vector<16x128xf32>
    %c0_12 = arith.constant 0 : index
    %c0_13 = arith.constant 0 : index
    %28 = vector.load %arg8[%c0_12, %c0_13] : memref<16x128xf32, #tpu.memory_space<vmem>>, vector<16x128xf32>
    tpu.vector_store %arg8[%c0_12, %c0_13], %27 {strides = array<i32>} : memref<16x128xf32, #tpu.memory_space<vmem>>, vector<16x128xf32>,
    %c0_i32_14 = arith.constant 0 : i32
    %29 = arith.cmpi eq, %arg1, %c0_i32_14 : i32
    %30 = arith.extui %29 : i1 to i32
    %c0_i32_15 = arith.constant 0 : i32
    %31 = arith.cmpi ne, %30, %c0_i32_15 : i32
    scf.if %31 {
      %c0_16 = arith.constant 0 : index
      %c0_17 = arith.constant 0 : index
      %32 = vector.load %arg7[%c0_16, %c0_17] : memref<16x128xf32, #tpu.memory_space<vmem>>, vector<16x128xf32>
      %cst_18 = arith.constant dense<0.000000e+00> : vector<128xf32>
      %33 = vector.multi_reduction <add>, %32, %cst_18 [0] : vector<16x128xf32> to vector<128xf32>
      %34 = vector.shape_cast %33 : vector<128xf32> to vector<1x128xf32>
      %c0_19 = arith.constant 0 : index
      %c0_20 = arith.constant 0 : index
      %c0_21 = arith.constant 0 : index
      %35 = vector.load %arg5[%c0_19, %c0_20, %c0_21] : memref<1x1x128xf32, #tpu.memory_space<vmem>>, vector<1x1x128xf32>
      %36 = vector.shape_cast %35 : vector<1x1x128xf32> to vector<1x128xf32>
      %37 = vector.shape_cast %34 : vector<1x128xf32> to vector<1x1x128xf32>
      tpu.vector_store %arg5[%c0_19, %c0_20, %c0_21], %37 {strides = array<i32>} : memref<1x1x128xf32, #tpu.memory_space<vmem>>, vector<1x1x128xf32>,
      %c0_22 = arith.constant 0 : index
      %c0_23 = arith.constant 0 : index
      %38 = vector.load %arg8[%c0_22, %c0_23] : memref<16x128xf32, #tpu.memory_space<vmem>>, vector<16x128xf32>
      %cst_24 = arith.constant dense<0.000000e+00> : vector<128xf32>
      %39 = vector.multi_reduction <add>, %38, %cst_24 [0] : vector<16x128xf32> to vector<128xf32>
      %40 = vector.shape_cast %39 : vector<128xf32> to vector<1x128xf32>
      %c0_25 = arith.constant 0 : index
      %c0_26 = arith.constant 0 : index
      %c0_27 = arith.constant 0 : index
      %41 = vector.load %arg6[%c0_25, %c0_26, %c0_27] : memref<1x1x128xf32, #tpu.memory_space<vmem>>, vector<1x1x128xf32>
      %42 = vector.shape_cast %41 : vector<1x1x128xf32> to vector<1x128xf32>
      %43 = vector.shape_cast %40 : vector<1x128xf32> to vector<1x1x128xf32>
      tpu.vector_store %arg6[%c0_25, %c0_26, %c0_27], %43 {strides = array<i32>} : memref<1x1x128xf32, #tpu.memory_space<vmem>>, vector<1x1x128xf32>,
    } else {
    }
    return
  }
  func.func @transform_0(%arg0: i32, %arg1: i32, %arg2: memref<2xi32, #tpu.memory_space<smem>>) -> (i32, i32, i32) {
    %c0_i32 = arith.constant 0 : i32
    %c0_i32_0 = arith.constant 0 : i32
    return %arg0, %arg1, %c0_i32 : i32, i32, i32
  }
  func.func @transform_1(%arg0: i32, %arg1: i32, %arg2: memref<2xi32, #tpu.memory_space<smem>>) -> (i32, i32, i32) {
    %c0_i32 = arith.constant 0 : i32
    %c0_i32_0 = arith.constant 0 : i32
    return %arg0, %arg1, %c0_i32 : i32, i32, i32
  }
  func.func @transform_2(%arg0: i32, %arg1: i32, %arg2: memref<2xi32, #tpu.memory_space<smem>>) -> (i32, i32, i32) {
    %c0_i32 = arith.constant 0 : i32
    %c0_i32_0 = arith.constant 0 : i32
    %c0_i32_1 = arith.constant 0 : i32
    return %arg0, %c0_i32, %c0_i32_0 : i32, i32, i32
  }
  func.func @transform_3(%arg0: i32, %arg1: i32, %arg2: memref<2xi32, #tpu.memory_space<smem>>) -> (i32, i32, i32) {
    %c0_i32 = arith.constant 0 : i32
    %c0_i32_0 = arith.constant 0 : i32
    %c0_i32_1 = arith.constant 0 : i32
    return %arg0, %c0_i32, %c0_i32_0 : i32, i32, i32
  }
}

</mosaic_0001>

<bundles_post_ra>
// kernel: tpu_custom_call.1
= control target key start
LH: loop header
LB: loop body
LE: loop exit
PB: predicated region body
PF: predicated region fallthrough
CT: control target
= control target key end

     0   :  { %s790_s18 = smov [#allocation5]   ;;  %s995_s0 = inlined_call_operand.hbm [shape: s32[2], index: 0, kind: input, shape index: {}]   ;;  %s996_s1 = inlined_call_operand.hbm [shape: f32[2,16,128], index: 1, kind: input, shape index: {}]   ;;  %s997_s2 = inlined_call_operand.hbm [shape: f32[2,16,128], index: 2, kind: input, shape index: {}]   ;;  %s998_s3 = inlined_call_operand.hbm [shape: f32[2,1,128], index: 3, kind: output, shape index: {0}]   ;;  %s999_s4 = inlined_call_operand.hbm [shape: f32[2,1,128], index: 4, kind: output, shape index: {1}]  }
   0x1   :  { %1000 = sst [smem:[#allocation19_spill]] %s996_s1  ;;  %s11_s17 = sshll.u32 %s995_s0, 4  ;;  %s12_s17 = int_to_ptr.hbm [resolvable:$true] %s11_s17 }
   0x2   :  { %14 = dma.hbm_to_smem %s12_s17, 16, %s790_s18, [#allocation4] }
   0x3   :  { %748 = dma.done.wait [#allocation4], 16 }
   0x4   :  { %749 = vsyncadd [#allocation4], 4294967280 }
   0x5   :  { %17 = sfence }
   0x6   :  { %18 = vsyncpa [#allocation7], 0 }
   0x7   :  { %20 = vsyncpa [#allocation7 + $0x1], 0 }
   0x8   :  { %21 = vsyncpa [#allocation10], 0 }
   0x9   :  { %23 = vsyncpa [#allocation10 + $0x1], 0 }
   0xa   :  { %24 = vsyncpa [#allocation8], 0 }
   0xb   :  { %26 = vsyncpa [#allocation8 + $0x1], 0 }
   0xc   :  { %27 = vsyncpa [#allocation13], 0 }
   0xd   :  { %29 = vsyncpa [#allocation13 + $0x1], 0  ;;  %s821_s19 = smov 0   ;;  %s823_s20 = smov 0  }
   0xe   :  { %s825_s21 = smov 0   ;;  %s827_s0 = smov 0  }
   0xf   :  { %s829_s22 = smov 0   ;;  %s831_s23 = smov 0  }
  0x10 LB: > { %s504_s24 = sadd.s32 4294967295, %s788_s23   ;;  %s505_s25 = sadd.s32 4294967294, %s788_s23   ;;  %s788_s23 = sphi %s831_s23, %s35_s23   ;;  %s784_s22 = sphi %s829_s22, %s1011_s22   ;;  %s780_s0 = sphi %s827_s0, %s1010_s0   ;;  %s776_s21 = sphi %s825_s21, %s1009_s21   ;;  %s772_s20 = sphi %s823_s20, %s1008_s20   ;;  %s768_s19 = sphi %s821_s19, %s1007_s19  }
  0x11   : > { %s47_s26 = sadd.s32 1, %s784_s22  ;;  %s56_s27 = sadd.s32 1, %s776_s21 }
  0x12   : > { %p49_p0 = scmp.ge.s32.totalorder %s47_s26, 2  ;;  %p63_p1 = scmp.ne.s32.totalorder %s776_s21, %s772_s20 }
  0x13   : > { %p64_p2 = scmp.eq.s32.totalorder %s788_s23, 0  ;;  %p69_p3 = scmp.ne.s32.totalorder %s772_s20, %s768_s19 }
  0x14   : > { %s1013_s26 = smov (%p49_p0, %s47_s26), 0  ;;  %p70_p5 = scmp.eq.s32.totalorder %s504_s24, 0 }
  0x15   : > { %p862_p4 = por %p64_p2, %p63_p1  ;;  %s51_s29 = ssub.s32 %s784_s22, %s1013_s26 }
  0x16   : > { %p121_p6 = scmp.eq.s32.totalorder %s504_s24, 1  ;;  %p54_p7 = scmp.eq.s32.totalorder %s51_s29, 0 }
  0x17   : > { %p868_p8 = por %p70_p5, %p69_p3  ;;  %p127_p10 = scmp.eq.s32.totalorder %s505_s25, 1 }
  0x18   : > { %p872_p9 = por %p121_p6, %p63_p1  ;;  %p507_p12 = scmp.ge.s32.totalorder %s788_s23, 2 }
  0x19   : > { %s877_s6 = scalar_select %p54_p7, %s776_s21, %s56_s27  }
  0x1a   : > { %p879_p11 = por %p127_p10, %p69_p3  ;;  %p543_p13 = scmp.lt.s32.totalorder %s788_s23, 2 }
  0x1b   : > { %s886_s8 = sand.u32 1, %s776_s21   ;;  %s519_s10 = sshll.u32 %s784_s22, 4 }
  0x1c   : > { %s508_s9 = sshll.u32 %s886_s8, 4  ;;  %s1005_s1 = sld [smem:[#allocation19_spill]] }
  0x1d   : > { %s177_s14 = scalar_lea.vmem [#allocation6], %s508_s9  ;;  %p895_p0 = pnand %p543_p13, %p862_p4 }
  0x1e   : > { %s187_s15 = sshll.u32 %s177_s14, 4  ;;  %p514_p1 = scmp.ge.s32.totalorder %s788_s23, 1  ;;  %s188_s15 = int_to_ptr.vmem [resolvable:$true] %s187_s15 }
  0x1f   : > { %s174_s18 = scalar_lea.sflag [#allocation7], %s886_s8  ;;  %s791_s24 = smov 128  }
  0x20   : > { %s792_s25 = smov 8   ;;  %p219_p2 = scmp.lt.s32.totalorder %s788_s23, 3 }
  0x21   : > { %s208_s11 = scalar_lea.hbm %s997_s2, %s519_s10  ;;  %s201_s28 = scalar_lea.vmem [#allocation9], %s508_s9 }
  0x22   : > { %s184_s13 = scalar_lea.hbm %s1005_s1, %s519_s10  ;;  %p220_p3 = pnand %p514_p1, %p219_p2 }
  0x23   : > { %s185_s16 = sshll.u32 %s184_s13, 4  ;;  %s209_s12 = sshll.u32 %s208_s11, 4  ;;  %s186_s16 = int_to_ptr.hbm [resolvable:$true] %s185_s16  ;;  %s210_s12 = int_to_ptr.hbm [resolvable:$true] %s209_s12 }
  0x24   : > { %532 = dma.hbm_to_vmem [thread:$0]  (!%p895_p0), %s186_s16, 256, %s188_s15, %s174_s18, %s791_s24, %s791_s24, %s792_s25  }
  0x25   : > { %s211_s13 = sshll.u32 %s201_s28, 4  ;;  %s198_s14 = scalar_lea.sflag [#allocation10], %s886_s8  ;;  %s212_s13 = int_to_ptr.vmem [resolvable:$true] %s211_s13 }
  0x26   : > { %535 = dma.hbm_to_vmem [thread:$0]  (!%p895_p0), %s210_s12, 256, %s212_s13, %s198_s14, %s791_s24, %s791_s24, %s792_s25  }
  0x27   : > { %223 = sbr.rel (%p220_p3) target bundleno = 91 (0x5b), region = 28  ;;  %s911_s1 = sand.u32 (!%p220_p3), 1, %s772_s20  }
  0x28   : > { %s515_s15 = sshll.u32 (!%p220_p3), %s911_s1, 4  ;;  %s226_s16 = scalar_lea.sflag (!%p220_p3), [#allocation7], %s911_s1 }
  0x29   : > { %s229_s18 = scalar_lea.vmem (!%p220_p3), [#allocation6], %s515_s15 }
  0x2c   : > { %751 = dma.done.wait (%p868_p8), %s226_s16, 256  }
  0x2d   : > { %753 = vsyncadd (%p868_p8), %s226_s16, 4294967040  ;;  %s236_s8 = scalar_lea.sflag [#allocation10], %s911_s1  ;;  %s239_s9 = scalar_lea.vmem [#allocation9], %s515_s15 }
  0x2e   : > { %755 = dma.done.wait (%p868_p8), %s236_s8, 256  }
  0x2f   : > { %757 = vsyncadd (%p868_p8), %s236_s8, 4294967040  ;;  %v287_v0 = vlaneseq  ;;  %s296_s10 = sld [smem:[#allocation5 + %s780_s0]]  ;;  %v281_v7 = vld [vmem:[%s229_s18] sm:$0xff]  ;;  %v282_v8 = vld [vmem:[%s229_s18 + $0x8] sm:$0xff]  ;;  %s356_s24 = scalar_lea.hbm %s998_s3, %s780_s0 }
  0x30   : > { %v283_v9 = vld [vmem:[%s239_s9] sm:$0xff]  ;;  %v284_v11 = vld [vmem:[%s239_s9 + $0x8] sm:$0xff]  ;;  %s369_s29 = scalar_lea.hbm %s999_s4, %s780_s0  ;;  %s264_s11 = scalar_lea.vmem [#allocation11], %s911_s1 }
  0x31   : > { %v288_v1 = vshrl.u32 %v287_v0, 7  ;;  %v293_v2 = vand.u32 127, %v287_v0  ;;  %v285_v12 = vsub.f32 %v281_v7, %v283_v9  ;;  %v286_v14 = vsub.f32 %v282_v8, %v284_v11  ;;  %s934_s12 = sshll.u32 %s264_s11, 4  ;;  %s270_s28 = scalar_lea.vmem [#allocation12], %s911_s1  ;;  %s359_s12 = int_to_ptr.vmem [resolvable:$true] %s934_s12 }
  0x32   : > { %s937_s13 = sshll.u32 %s270_s28, 4  ;;  %s360_s14 = sshll.u32 %s356_s24, 4  ;;  %s372_s13 = int_to_ptr.vmem [resolvable:$true] %s937_s13  ;;  %s361_s14 = int_to_ptr.hbm [resolvable:$true] %s360_s14 }
  0x33   : > { %v289_v3 = vadd.s32 8, %v288_v1  ;;  %v290_v4 = vmul.u32 128, %v288_v1  ;;  %s939_s15 = sshll.u32 %s369_s29, 4  ;;  %s344_s0 = scalar_lea.sflag [#allocation8], %s911_s1  ;;  %s374_s15 = int_to_ptr.hbm [resolvable:$true] %s939_s15 }
  0x34   : > { %s682_s16 = sshra.s32 %s361_s14, 4  ;;  %s683_s16 = int_to_ptr.hbm [resolvable:$true] %s682_s16 }
  0x35   : > { %v291_v5 = vmul.u32 128, %v289_v3  ;;  %v294_v6 = vadd.s32 %v293_v2, %v290_v4  ;;  %v299_v10 = vstv %s296_s10  ;;  %s684_s18 = scalar_lea.hbm %s683_s16, 1  ;;  %s688_s10 = scalar_lea.hbm %s998_s3, 2 }
  0x36   : > { %p685_p4 = scmp.ne.s32.totalorder %s683_s16, %s684_s18  ;;  %p689_p7 = scmp.lt.s32.totalorder %s683_s16, %s998_s3 }
  0x37   : > { %v295_v13 = vadd.s32 %v293_v2, %v291_v5  ;;  %vm300_vm0 = vcmp.lt.s32.totalorder %v294_v6, %v299_v10  ;;  %p690_p8 = scmp.lt.s32.totalorder %s688_s10, %s684_s18 }
  0x38   : > { %v302_v15 = vsel %vm300_vm0, %v285_v12, 0.0  ;;  %p686_p5 = pnand %p685_p4, %p872_p9 }
  0x39   : > { %vm301_vm1 = vcmp.lt.s32.totalorder %v295_v13, %v299_v10  ;;  %v306_v17 = vand.u32 2147483647, %v302_v15  ;;  %v314_v18 = vmul.f32 %v302_v15, %v302_v15  ;;  %p691_p10 = por %p690_p8, %p689_p7 }
  0x3a   : > { %v303_v16 = vsel %vm301_vm1, %v286_v14, 0.0  ;;  %p687_p6 = pneg %p686_p5 }
  0x3b   : > { %v307_v19 = vand.u32 2147483647, %v303_v16  ;;  %v315_v20 = vmul.f32 %v303_v16, %v303_v16 }
  0x3c   : > { %p692_p13 = pnand %p691_p10, %p687_p6 }
  0x3d   : > { %v325_v21 = vadd.f32 %v307_v19, %v306_v17  ;;  %v335_v22 = vadd.f32 %v315_v20, %v314_v18 }
  0x3f   : > { %v326_v23 = vrot.slane %v325_v21, 4  ;;  %v336_v24 = vrot.slane %v335_v22, 4 }
  0x41   : > { %v327_v25 = vadd.f32 %v326_v23, %v325_v21  ;;  %v337_v26 = vadd.f32 %v336_v24, %v335_v22 }
  0x43   : > { %v328_v27 = vrot.slane %v327_v25, 2  ;;  %v338_v28 = vrot.slane %v337_v26, 2 }
  0x45   : > { %v329_v29 = vadd.f32 %v328_v27, %v327_v25  ;;  %v339_v30 = vadd.f32 %v338_v28, %v337_v26 }
  0x47   : > { %v330_v31 = vrot.slane %v329_v29, 1  ;;  %v340_v32 = vrot.slane %v339_v30, 1 }
  0x49   : > { %v331_v33 = vadd.f32 %v330_v31, %v329_v29  ;;  %v341_v34 = vadd.f32 %v340_v32, %v339_v30 }
  0x4b   : > { %332 = vst [vmem:[%s264_s11] sm:$0x1] %v331_v33 }
  0x4c   : > { %342 = vst [vmem:[%s270_s28] sm:$0x1] %v341_v34 }
  0x4d   : > { %695 = shalt.err (!%p692_p13)
}
  0x4e   : > { %525 = dma.vmem_to_hbm [thread:$0]  (%p872_p9), %s359_s12, 16, %s361_s14, %s344_s0  }
  0x4f   : > { %s348_s24 = scalar_lea.sflag [#allocation13], %s911_s1  ;;  %s710_s25 = sshra.s32 %s374_s15, 4  ;;  %s711_s25 = int_to_ptr.hbm [resolvable:$true] %s710_s25 }
  0x50   : > { %s712_s27 = scalar_lea.hbm %s711_s25, 1  ;;  %s716_s28 = scalar_lea.hbm %s999_s4, 2 }
  0x51   : > { %p713_p0 = scmp.ne.s32.totalorder %s711_s25, %s712_s27  ;;  %p717_p3 = scmp.lt.s32.totalorder %s711_s25, %s999_s4 }
  0x52   : > { %p718_p4 = scmp.lt.s32.totalorder %s716_s28, %s712_s27 }
  0x53   : > { %p714_p1 = pnand %p713_p0, %p872_p9 }
  0x54   : > { %p719_p5 = por %p718_p4, %p717_p3 }
  0x55   : > { %p715_p2 = pneg %p714_p1 }
  0x57   : > { %p720_p6 = pnand %p719_p5, %p715_p2 }
  0x59   : > { %723 = shalt.err (!%p720_p6)
}
  0x5a   : > { %526 = dma.vmem_to_hbm [thread:$0]  (%p872_p9), %s372_s13, 16, %s374_s15, %s348_s24  }
  0x5b PF: > { %s385_s1 = sand.u32 1, %s768_s19   ;;  %p537_p7 = pnand %p507_p12, %p879_p11 }
  0x5c   : > { %s386_s12 = scalar_lea.sflag [#allocation8], %s385_s1 }
  0x5d   : > { %p538_p8 = pneg %p537_p7 }
  0x5f   : > { %759 = dma.done.wait (%p538_p8), %s386_s12, 16  }
  0x60   : > { %761 = vsyncadd (%p538_p8), %s386_s12, 4294967280  ;;  %s395_s14 = scalar_lea.sflag [#allocation13], %s385_s1 }
  0x61   : > { %763 = dma.done.wait (%p538_p8), %s395_s14, 16  }
  0x62   : > { %765 = vsyncadd (%p538_p8), %s395_s14, 4294967280  ;;  %s35_s23 = sadd.s32 1, %s788_s23   ;;  %s1007_s19 = smov %s772_s20 }
  0x63   : > { %p32_p10 = scmp.ge.s32.totalorder %s35_s23, 4   ;;  %s1008_s20 = smov %s776_s21 }
  0x64   : > { %s1009_s21 = smov %s877_s6  ;;  %s1010_s0 = smov %s784_s22 }
  0x65   : > { %s1011_s22 = smov %s1013_s26  ;;  %34 = sbr.rel (!%p32_p10) target bundleno = 16 (0x10), region = 111 }
  0x6a   :  { %400 = vsyncpa [#allocation7], 1 }
  0x6b   :  { %402 = vsyncpa [#allocation7 + $0x1], 1 }
  0x6c   :  { %403 = vsyncpa [#allocation10], 1 }
  0x6d   :  { %405 = vsyncpa [#allocation10 + $0x1], 1 }
  0x6e   :  { %406 = vsyncpa [#allocation8], 1 }
  0x6f   :  { %408 = vsyncpa [#allocation8 + $0x1], 1 }
  0x70   :  { %409 = vsyncpa [#allocation13], 1 }
  0x71   :  { %411 = vsyncpa [#allocation13 + $0x1], 1 }

</bundles_post_ra>
